<compile_context>
chip_gen: v7x
topology: tpu7x:2x2x1
jax: 0.10.0
libtpu: 0.0.40
codegen_flags: <defaults>
</compile_context>

<pallas_src>
from functools import partial

import jax
import jax.numpy as jnp
from jax import lax
from jax.experimental import pallas as pl
from jax.experimental.pallas import tpu as pltpu


# --------------------------------------------------------------------------
# Pallas kernel
# --------------------------------------------------------------------------
def _block_kernel(shifts, x_ref, w_up_ref, up_b_ref, wl_ref, wr_ref,
                  mask_ref, w_lo_ref, lo_b_ref, o_ref):
    x = x_ref[0]                                          # (Cin, HW)

    # upper: 1x1 conv (BN scale pre-folded into w_up) + bias + ReLU
    up = jnp.dot(w_up_ref[...], x, preferred_element_type=jnp.float32)
    up = jnp.maximum(up + up_b_ref[...], 0.0)             # (Cf, HW), lane-dense

    # Depthwise kxk convs (stride 1, 'same').  Each tap = one XLU roll of the
    # flattened map + precomputed boundary mask, shared by left AND right.
    left = jnp.zeros_like(up)
    right = jnp.zeros_like(up)
    for t, s in enumerate(shifts):                        # static unroll (k*k)
        if s == 0:                                        # center tap: no roll, mask is all-ones
            sm = up
        else:
            sm = pltpu.roll(up, shift=s, axis=1) * mask_ref[t]   # (Cf,HW)*(1,HW)
        left = left + sm * wl_ref[t]                      # wl_ref[t]: (Cf, 1)
        right = right + sm * wr_ref[t]
    left = jnp.maximum(left, 0.0)
    right = jnp.maximum(right, 0.0)

    # ReLUBabylon(a, b) == a * b exactly for a, b >= 0 (both are post-ReLU).
    m = left * right

    # lower: 1x1 conv (BN scale pre-folded into w_lo) + bias + ReLU
    low = jnp.dot(w_lo_ref[...], m, preferred_element_type=jnp.float32)
    o_ref[0] = jnp.maximum(low + lo_b_ref[...], 0.0).astype(o_ref.dtype)


# --------------------------------------------------------------------------
# Wrapper
# --------------------------------------------------------------------------
def _make_taps(H, W, k, pad):
    """Per-tap flat roll shifts and boundary-validity masks (precomputed)."""
    HW = H * W
    hh = jnp.arange(H)[:, None]
    ww = jnp.arange(W)[None, :]
    masks, shifts = [], []
    for dy in range(k):
        for dx in range(k):
            oy, ox = dy - pad, dx - pad
            valid = ((hh + oy >= 0) & (hh + oy < H) &
                     (ww + ox >= 0) & (ww + ox < W))
            masks.append(valid.reshape(1, HW).astype(jnp.float32))
            shifts.append((-(oy * W + ox)) % HW)          # non-negative shift
    return jnp.stack(masks, axis=0), tuple(shifts)        # (k*k,1,HW), ints


def abs_relu_block_no_norm(x_nchw, p, *, k, stride):
    # TODO(synk): only stride=1 implemented (padding=k//2 'same', odd k).
    assert stride == 1, "kernel implements stride=1 (padding=k//2, 'same')"
    pad = k // 2
    N, Cin, H, W = x_nchw.shape
    Cf = p["w_up"].shape[0]
    Cout = p["w_lo"].shape[0]
    HW = H * W

    masks, shifts = _make_taps(H, W, k, pad)
    x_flat = x_nchw.reshape(N, Cin, HW).astype(jnp.float32)

    # TODO(synk): for large H*W, add a haloed spatial grid axis and re-derive
    # tile sizes per generation (v7x: 64 MiB VMEM); bf16 VPU stage would help
    # on v6e/v7x but not v5e — kept f32 for exactness here.
    out_flat = pl.pallas_call(
        partial(_block_kernel, shifts),
        out_shape=jax.ShapeDtypeStruct((N, Cout, HW), jnp.float32),
        grid_spec=pltpu.PrefetchScalarGridSpec(
            num_scalar_prefetch=0,
            grid=(N,),
            in_specs=[
                pl.BlockSpec((1, Cin, HW), lambda n: (n, 0, 0)),        # x
                pl.BlockSpec((Cf, Cin), lambda n: (0, 0)),              # w_up (scaled)
                pl.BlockSpec((Cf, 1), lambda n: (0, 0)),                # up bias
                pl.BlockSpec((k * k, Cf, 1), lambda n: (0, 0, 0)),      # w_left taps
                pl.BlockSpec((k * k, Cf, 1), lambda n: (0, 0, 0)),      # w_right taps
                pl.BlockSpec((k * k, 1, HW), lambda n: (0, 0, 0)),      # tap masks
                pl.BlockSpec((Cout, Cf), lambda n: (0, 0)),             # w_lo (scaled)
                pl.BlockSpec((Cout, 1), lambda n: (0, 0)),              # lo bias
            ],
            out_specs=pl.BlockSpec((1, Cout, HW), lambda n: (n, 0, 0)),
        ),
        compiler_params=pltpu.CompilerParams(
            dimension_semantics=("parallel",)),
    )(x_flat, p["w_up"], p["up_b"], p["w_left"], p["w_right"],
      masks, p["w_lo"], p["lo_b"])

    return out_flat.reshape(N, Cout, H, W)                 # already NCHW


# --------------------------------------------------------------------------
# Pure-JAX reference (PyTorch semantics, eval-mode BN, full Babylon formula)
# --------------------------------------------------------------------------
def _relu_babylon(a, b):
    # TODO(synk): ReLUBabylon is not defined in the provided source; assumed
    # quarter-square product built from ReLUs:
    #   a*b = ( relu(a+b)^2 - relu(a-b)^2 - relu(b-a)^2 ) / 4
    s = jnp.maximum(a + b, 0.0)
    d1 = jnp.maximum(a - b, 0.0)
    d2 = jnp.maximum(b - a, 0.0)
    return 0.25 * (s * s - d1 * d1 - d2 * d2)


def _reference(x_nchw, raw, *, k, stride):
    pad = k // 2
    eps = 1e-5
    dn = ("NCHW", "OIHW", "NCHW")
    prec = lax.Precision.HIGHEST

    def bn(y, g, b, m, v):
        return (g[None, :, None, None] * (y - m[None, :, None, None])
                / jnp.sqrt(v[None, :, None, None] + eps)
                + b[None, :, None, None])

    y = lax.conv_general_dilated(x_nchw, raw["w_up_oihw"], (1, 1), "VALID",
                                 dimension_numbers=dn, precision=prec)
    y = jnp.maximum(bn(y, *raw["bn_up"]), 0.0)
    l = lax.conv_general_dilated(y, raw["w_left_oihw"], (stride, stride),
                                 [(pad, pad), (pad, pad)], dimension_numbers=dn,
                                 feature_group_count=y.shape[1], precision=prec)
    l = jnp.maximum(l, 0.0)
    r = lax.conv_general_dilated(y, raw["w_right_oihw"], (stride, stride),
                                 [(pad, pad), (pad, pad)], dimension_numbers=dn,
                                 feature_group_count=y.shape[1], precision=prec)
    r = jnp.maximum(r, 0.0)
    m = _relu_babylon(l, r)
    z = lax.conv_general_dilated(m, raw["w_lo_oihw"], (1, 1), "VALID",
                                 dimension_numbers=dn, precision=prec)
    return jnp.maximum(bn(z, *raw["bn_lo"]), 0.0)


def _fold_bn(g, b, m, v, eps=1e-5):
    scale = g / jnp.sqrt(v + eps)
    bias = b - m * scale
    return scale, bias


# --------------------------------------------------------------------------
if __name__ == "__main__":
    # module hyper-params
    in_dim, out_dim, k, stride, q = 4, 8, 3, 1, 2.0
    feat_dim = int(q * out_dim)           # 16
    N, H, W = 2, 16, 16

    key = jax.random.PRNGKey(0)
    ks = jax.random.split(key, 12)

    raw = {
        "w_up_oihw":    0.1 * jax.random.normal(ks[0], (feat_dim, in_dim, 1, 1), jnp.float32),
        "w_left_oihw":  0.1 * jax.random.normal(ks[1], (feat_dim, 1, k, k), jnp.float32),
        "w_right_oihw": 0.1 * jax.random.normal(ks[2], (feat_dim, 1, k, k), jnp.float32),
        "w_lo_oihw":    0.1 * jax.random.normal(ks[3], (out_dim, feat_dim, 1, 1), jnp.float32),
        "bn_up": (jax.random.uniform(ks[4], (feat_dim,), minval=0.5, maxval=1.5),
                  0.1 * jax.random.normal(ks[5], (feat_dim,)),
                  0.1 * jax.random.normal(ks[6], (feat_dim,)),
                  jax.random.uniform(ks[7], (feat_dim,), minval=0.5, maxval=1.5)),
        "bn_lo": (jax.random.uniform(ks[8], (out_dim,), minval=0.5, maxval=1.5),
                  0.1 * jax.random.normal(ks[9], (out_dim,)),
                  0.1 * jax.random.normal(ks[10], (out_dim,)),
                  jax.random.uniform(ks[11], (out_dim,), minval=0.5, maxval=1.5)),
    }

    up_s, up_b = _fold_bn(*raw["bn_up"])
    lo_s, lo_b = _fold_bn(*raw["bn_lo"])

    params = {
        # BN scale folded into the 1x1 weights (channels-first layout).
        "w_up": (up_s[:, None] * raw["w_up_oihw"][:, :, 0, 0]).astype(jnp.float32),   # (Cf, Cin)
        "w_lo": (lo_s[:, None] * raw["w_lo_oihw"][:, :, 0, 0]).astype(jnp.float32),   # (Cout, Cf)
        "up_b": up_b[:, None].astype(jnp.float32),                                     # (Cf, 1)
        "lo_b": lo_b[:, None].astype(jnp.float32),                                     # (Cout, 1)
        # depthwise taps laid out (k*k, Cf, 1), tap index t = dy*k + dx
        "w_left":  jnp.transpose(raw["w_left_oihw"][:, 0], (1, 2, 0))
                     .reshape(k * k, feat_dim)[:, :, None].astype(jnp.float32),
        "w_right": jnp.transpose(raw["w_right_oihw"][:, 0], (1, 2, 0))
                     .reshape(k * k, feat_dim)[:, :, None].astype(jnp.float32),
    }

    x = jax.random.normal(jax.random.PRNGKey(42), (N, in_dim, H, W), jnp.float32)

    out = abs_relu_block_no_norm(x, params, k=k, stride=stride)
    out = jax.block_until_ready(out)

    ref = jax.block_until_ready(_reference(x, raw, k=k, stride=stride))
    assert out.shape == (N, out_dim, H, W)
    assert jnp.allclose(out, ref, rtol=2e-3, atol=2e-3), float(jnp.max(jnp.abs(out - ref)))

    print("KERNEL_OK")
</pallas_src>

<mosaic_0001>
module attributes {stable_mosaic.version = 11 : i64} {
  func.func @_block_kernel(%arg0: i32, %arg1: memref<1x4x256xf32, #tpu.memory_space<vmem>>, %arg2: memref<16x4xf32, #tpu.memory_space<vmem>>, %arg3: memref<16x1xf32, #tpu.memory_space<vmem>>, %arg4: memref<9x16x1xf32, #tpu.memory_space<vmem>>, %arg5: memref<9x16x1xf32, #tpu.memory_space<vmem>>, %arg6: memref<9x1x256xf32, #tpu.memory_space<vmem>>, %arg7: memref<8x16xf32, #tpu.memory_space<vmem>>, %arg8: memref<8x1xf32, #tpu.memory_space<vmem>>, %arg9: memref<1x8x256xf32, #tpu.memory_space<vmem>>) attributes {dimension_semantics = [#tpu.dimension_semantics<parallel>], iteration_bounds = array<i64: 2>, scalar_prefetch = 0 : i64, scratch_operands = 0 : i64, tpu.core_type = #tpu.core_type<tc>, window_params = [{transform_indices = @transform_0, window_bounds = array<i64: 1, 4, 256>}, {pipeline_mode = #tpu.pipeline_mode<synchronous>, transform_indices = @transform_1, window_bounds = array<i64: 16, 4>}, {pipeline_mode = #tpu.pipeline_mode<synchronous>, transform_indices = @transform_2, window_bounds = array<i64: 16, 1>}, {pipeline_mode = #tpu.pipeline_mode<synchronous>, transform_indices = @transform_3, window_bounds = array<i64: 9, 16, 1>}, {pipeline_mode = #tpu.pipeline_mode<synchronous>, transform_indices = @transform_4, window_bounds = array<i64: 9, 16, 1>}, {pipeline_mode = #tpu.pipeline_mode<synchronous>, transform_indices = @transform_5, window_bounds = array<i64: 9, 1, 256>}, {pipeline_mode = #tpu.pipeline_mode<synchronous>, transform_indices = @transform_6, window_bounds = array<i64: 8, 16>}, {pipeline_mode = #tpu.pipeline_mode<synchronous>, transform_indices = @transform_7, window_bounds = array<i64: 8, 1>}, {transform_indices = @transform_8, window_bounds = array<i64: 1, 8, 256>}]} {
    %c0 = arith.constant 0 : index
    %c0_0 = arith.constant 0 : index
    %c0_1 = arith.constant 0 : index
    %0 = vector.load %arg1[%c0, %c0_0, %c0_1] : memref<1x4x256xf32, #tpu.memory_space<vmem>>, vector<1x4x256xf32>
    %1 = vector.shape_cast %0 : vector<1x4x256xf32> to vector<4x256xf32>
    %c0_2 = arith.constant 0 : index
    %c0_3 = arith.constant 0 : index
    %2 = vector.load %arg2[%c0_2, %c0_3] : memref<16x4xf32, #tpu.memory_space<vmem>>, vector<16x4xf32>
    %cst = arith.constant dense<0.000000e+00> : vector<16x256xf32>
    %3 = tpu.matmul %2, %1, %cst {dimension_numbers = #tpu.dot_dimension_numbers<[1], [0], [0], [1], [0, 0, 1, 1], [], []>} : vector<16x4xf32>, vector<4x256xf32>, vector<16x256xf32> -> vector<16x256xf32>
    %c0_4 = arith.constant 0 : index
    %c0_5 = arith.constant 0 : index
    %4 = vector.load %arg3[%c0_4, %c0_5] : memref<16x1xf32, #tpu.memory_space<vmem>>, vector<16x1xf32>
    %5 = vector.broadcast %4 : vector<16x1xf32> to vector<16x256xf32>
    %6 = arith.addf %3, %5 : vector<16x256xf32>
    %cst_6 = arith.constant 0.000000e+00 : f32
    %7 = vector.broadcast %cst_6 : f32 to vector<16x256xf32>
    %8 = arith.maximumf %6, %7 : vector<16x256xf32>
    %cst_7 = arith.constant 0.000000e+00 : f32
    %9 = vector.broadcast %cst_7 : f32 to vector<16x256xf32>
    %cst_8 = arith.constant 0.000000e+00 : f32
    %10 = vector.broadcast %cst_8 : f32 to vector<16x256xf32>
    %c17_i32 = arith.constant 17 : i32
    %11 = tpu.dynamic_rotate %8 by %c17_i32 dim 1 : vector<16x256xf32>, i32 -> vector<16x256xf32>
    %c0_9 = arith.constant 0 : index
    %c0_10 = arith.constant 0 : index
    %c0_11 = arith.constant 0 : index
    %12 = vector.load %arg6[%c0_9, %c0_10, %c0_11] : memref<9x1x256xf32, #tpu.memory_space<vmem>>, vector<1x1x256xf32>
    %13 = vector.shape_cast %12 : vector<1x1x256xf32> to vector<1x256xf32>
    %14 = vector.broadcast %13 : vector<1x256xf32> to vector<16x256xf32>
    %15 = arith.mulf %11, %14 : vector<16x256xf32>
    %c0_12 = arith.constant 0 : index
    %c0_13 = arith.constant 0 : index
    %c0_14 = arith.constant 0 : index
    %16 = vector.load %arg4[%c0_12, %c0_13, %c0_14] : memref<9x16x1xf32, #tpu.memory_space<vmem>>, vector<1x16x1xf32>
    %17 = vector.shape_cast %16 : vector<1x16x1xf32> to vector<16x1xf32>
    %18 = vector.broadcast %17 : vector<16x1xf32> to vector<16x256xf32>
    %19 = arith.mulf %15, %18 : vector<16x256xf32>
    %20 = arith.addf %9, %19 : vector<16x256xf32>
    %c0_15 = arith.constant 0 : index
    %c0_16 = arith.constant 0 : index
    %c0_17 = arith.constant 0 : index
    %21 = vector.load %arg5[%c0_15, %c0_16, %c0_17] : memref<9x16x1xf32, #tpu.memory_space<vmem>>, vector<1x16x1xf32>
    %22 = vector.shape_cast %21 : vector<1x16x1xf32> to vector<16x1xf32>
    %23 = vector.broadcast %22 : vector<16x1xf32> to vector<16x256xf32>
    %24 = arith.mulf %15, %23 : vector<16x256xf32>
    %25 = arith.addf %10, %24 : vector<16x256xf32>
    %c16_i32 = arith.constant 16 : i32
    %26 = tpu.dynamic_rotate %8 by %c16_i32 dim 1 : vector<16x256xf32>, i32 -> vector<16x256xf32>
    %c1 = arith.constant 1 : index
    %c0_18 = arith.constant 0 : index
    %c0_19 = arith.constant 0 : index
    %27 = vector.load %arg6[%c1, %c0_18, %c0_19] : memref<9x1x256xf32, #tpu.memory_space<vmem>>, vector<1x1x256xf32>
    %28 = vector.shape_cast %27 : vector<1x1x256xf32> to vector<1x256xf32>
    %29 = vector.broadcast %28 : vector<1x256xf32> to vector<16x256xf32>
    %30 = arith.mulf %26, %29 : vector<16x256xf32>
    %c1_20 = arith.constant 1 : index
    %c0_21 = arith.constant 0 : index
    %c0_22 = arith.constant 0 : index
    %31 = vector.load %arg4[%c1_20, %c0_21, %c0_22] : memref<9x16x1xf32, #tpu.memory_space<vmem>>, vector<1x16x1xf32>
    %32 = vector.shape_cast %31 : vector<1x16x1xf32> to vector<16x1xf32>
    %33 = vector.broadcast %32 : vector<16x1xf32> to vector<16x256xf32>
    %34 = arith.mulf %30, %33 : vector<16x256xf32>
    %35 = arith.addf %20, %34 : vector<16x256xf32>
    %c1_23 = arith.constant 1 : index
    %c0_24 = arith.constant 0 : index
    %c0_25 = arith.constant 0 : index
    %36 = vector.load %arg5[%c1_23, %c0_24, %c0_25] : memref<9x16x1xf32, #tpu.memory_space<vmem>>, vector<1x16x1xf32>
    %37 = vector.shape_cast %36 : vector<1x16x1xf32> to vector<16x1xf32>
    %38 = vector.broadcast %37 : vector<16x1xf32> to vector<16x256xf32>
    %39 = arith.mulf %30, %38 : vector<16x256xf32>
    %40 = arith.addf %25, %39 : vector<16x256xf32>
    %c15_i32 = arith.constant 15 : i32
    %41 = tpu.dynamic_rotate %8 by %c15_i32 dim 1 : vector<16x256xf32>, i32 -> vector<16x256xf32>
    %c2 = arith.constant 2 : index
    %c0_26 = arith.constant 0 : index
    %c0_27 = arith.constant 0 : index
    %42 = vector.load %arg6[%c2, %c0_26, %c0_27] : memref<9x1x256xf32, #tpu.memory_space<vmem>>, vector<1x1x256xf32>
    %43 = vector.shape_cast %42 : vector<1x1x256xf32> to vector<1x256xf32>
    %44 = vector.broadcast %43 : vector<1x256xf32> to vector<16x256xf32>
    %45 = arith.mulf %41, %44 : vector<16x256xf32>
    %c2_28 = arith.constant 2 : index
    %c0_29 = arith.constant 0 : index
    %c0_30 = arith.constant 0 : index
    %46 = vector.load %arg4[%c2_28, %c0_29, %c0_30] : memref<9x16x1xf32, #tpu.memory_space<vmem>>, vector<1x16x1xf32>
    %47 = vector.shape_cast %46 : vector<1x16x1xf32> to vector<16x1xf32>
    %48 = vector.broadcast %47 : vector<16x1xf32> to vector<16x256xf32>
    %49 = arith.mulf %45, %48 : vector<16x256xf32>
    %50 = arith.addf %35, %49 : vector<16x256xf32>
    %c2_31 = arith.constant 2 : index
    %c0_32 = arith.constant 0 : index
    %c0_33 = arith.constant 0 : index
    %51 = vector.load %arg5[%c2_31, %c0_32, %c0_33] : memref<9x16x1xf32, #tpu.memory_space<vmem>>, vector<1x16x1xf32>
    %52 = vector.shape_cast %51 : vector<1x16x1xf32> to vector<16x1xf32>
    %53 = vector.broadcast %52 : vector<16x1xf32> to vector<16x256xf32>
    %54 = arith.mulf %45, %53 : vector<16x256xf32>
    %55 = arith.addf %40, %54 : vector<16x256xf32>
    %c1_i32 = arith.constant 1 : i32
    %56 = tpu.dynamic_rotate %8 by %c1_i32 dim 1 : vector<16x256xf32>, i32 -> vector<16x256xf32>
    %c3 = arith.constant 3 : index
    %c0_34 = arith.constant 0 : index
    %c0_35 = arith.constant 0 : index
    %57 = vector.load %arg6[%c3, %c0_34, %c0_35] : memref<9x1x256xf32, #tpu.memory_space<vmem>>, vector<1x1x256xf32>
    %58 = vector.shape_cast %57 : vector<1x1x256xf32> to vector<1x256xf32>
    %59 = vector.broadcast %58 : vector<1x256xf32> to vector<16x256xf32>
    %60 = arith.mulf %56, %59 : vector<16x256xf32>
    %c3_36 = arith.constant 3 : index
    %c0_37 = arith.constant 0 : index
    %c0_38 = arith.constant 0 : index
    %61 = vector.load %arg4[%c3_36, %c0_37, %c0_38] : memref<9x16x1xf32, #tpu.memory_space<vmem>>, vector<1x16x1xf32>
    %62 = vector.shape_cast %61 : vector<1x16x1xf32> to vector<16x1xf32>
    %63 = vector.broadcast %62 : vector<16x1xf32> to vector<16x256xf32>
    %64 = arith.mulf %60, %63 : vector<16x256xf32>
    %65 = arith.addf %50, %64 : vector<16x256xf32>
    %c3_39 = arith.constant 3 : index
    %c0_40 = arith.constant 0 : index
    %c0_41 = arith.constant 0 : index
    %66 = vector.load %arg5[%c3_39, %c0_40, %c0_41] : memref<9x16x1xf32, #tpu.memory_space<vmem>>, vector<1x16x1xf32>
    %67 = vector.shape_cast %66 : vector<1x16x1xf32> to vector<16x1xf32>
    %68 = vector.broadcast %67 : vector<16x1xf32> to vector<16x256xf32>
    %69 = arith.mulf %60, %68 : vector<16x256xf32>
    %70 = arith.addf %55, %69 : vector<16x256xf32>
    %c4 = arith.constant 4 : index
    %c0_42 = arith.constant 0 : index
    %c0_43 = arith.constant 0 : index
    %71 = vector.load %arg4[%c4, %c0_42, %c0_43] : memref<9x16x1xf32, #tpu.memory_space<vmem>>, vector<1x16x1xf32>
    %72 = vector.shape_cast %71 : vector<1x16x1xf32> to vector<16x1xf32>
    %73 = vector.broadcast %72 : vector<16x1xf32> to vector<16x256xf32>
    %74 = arith.mulf %8, %73 : vector<16x256xf32>
    %75 = arith.addf %65, %74 : vector<16x256xf32>
    %c4_44 = arith.constant 4 : index
    %c0_45 = arith.constant 0 : index
    %c0_46 = arith.constant 0 : index
    %76 = vector.load %arg5[%c4_44, %c0_45, %c0_46] : memref<9x16x1xf32, #tpu.memory_space<vmem>>, vector<1x16x1xf32>
    %77 = vector.shape_cast %76 : vector<1x16x1xf32> to vector<16x1xf32>
    %78 = vector.broadcast %77 : vector<16x1xf32> to vector<16x256xf32>
    %79 = arith.mulf %8, %78 : vector<16x256xf32>
    %80 = arith.addf %70, %79 : vector<16x256xf32>
    %c255_i32 = arith.constant 255 : i32
    %81 = tpu.dynamic_rotate %8 by %c255_i32 dim 1 : vector<16x256xf32>, i32 -> vector<16x256xf32>
    %c5 = arith.constant 5 : index
    %c0_47 = arith.constant 0 : index
    %c0_48 = arith.constant 0 : index
    %82 = vector.load %arg6[%c5, %c0_47, %c0_48] : memref<9x1x256xf32, #tpu.memory_space<vmem>>, vector<1x1x256xf32>
    %83 = vector.shape_cast %82 : vector<1x1x256xf32> to vector<1x256xf32>
    %84 = vector.broadcast %83 : vector<1x256xf32> to vector<16x256xf32>
    %85 = arith.mulf %81, %84 : vector<16x256xf32>
    %c5_49 = arith.constant 5 : index
    %c0_50 = arith.constant 0 : index
    %c0_51 = arith.constant 0 : index
    %86 = vector.load %arg4[%c5_49, %c0_50, %c0_51] : memref<9x16x1xf32, #tpu.memory_space<vmem>>, vector<1x16x1xf32>
    %87 = vector.shape_cast %86 : vector<1x16x1xf32> to vector<16x1xf32>
    %88 = vector.broadcast %87 : vector<16x1xf32> to vector<16x256xf32>
    %89 = arith.mulf %85, %88 : vector<16x256xf32>
    %90 = arith.addf %75, %89 : vector<16x256xf32>
    %c5_52 = arith.constant 5 : index
    %c0_53 = arith.constant 0 : index
    %c0_54 = arith.constant 0 : index
    %91 = vector.load %arg5[%c5_52, %c0_53, %c0_54] : memref<9x16x1xf32, #tpu.memory_space<vmem>>, vector<1x16x1xf32>
    %92 = vector.shape_cast %91 : vector<1x16x1xf32> to vector<16x1xf32>
    %93 = vector.broadcast %92 : vector<16x1xf32> to vector<16x256xf32>
    %94 = arith.mulf %85, %93 : vector<16x256xf32>
    %95 = arith.addf %80, %94 : vector<16x256xf32>
    %c241_i32 = arith.constant 241 : i32
    %96 = tpu.dynamic_rotate %8 by %c241_i32 dim 1 : vector<16x256xf32>, i32 -> vector<16x256xf32>
    %c6 = arith.constant 6 : index
    %c0_55 = arith.constant 0 : index
    %c0_56 = arith.constant 0 : index
    %97 = vector.load %arg6[%c6, %c0_55, %c0_56] : memref<9x1x256xf32, #tpu.memory_space<vmem>>, vector<1x1x256xf32>
    %98 = vector.shape_cast %97 : vector<1x1x256xf32> to vector<1x256xf32>
    %99 = vector.broadcast %98 : vector<1x256xf32> to vector<16x256xf32>
    %100 = arith.mulf %96, %99 : vector<16x256xf32>
    %c6_57 = arith.constant 6 : index
    %c0_58 = arith.constant 0 : index
    %c0_59 = arith.constant 0 : index
    %101 = vector.load %arg4[%c6_57, %c0_58, %c0_59] : memref<9x16x1xf32, #tpu.memory_space<vmem>>, vector<1x16x1xf32>
    %102 = vector.shape_cast %101 : vector<1x16x1xf32> to vector<16x1xf32>
    %103 = vector.broadcast %102 : vector<16x1xf32> to vector<16x256xf32>
    %104 = arith.mulf %100, %103 : vector<16x256xf32>
    %105 = arith.addf %90, %104 : vector<16x256xf32>
    %c6_60 = arith.constant 6 : index
    %c0_61 = arith.constant 0 : index
    %c0_62 = arith.constant 0 : index
    %106 = vector.load %arg5[%c6_60, %c0_61, %c0_62] : memref<9x16x1xf32, #tpu.memory_space<vmem>>, vector<1x16x1xf32>
    %107 = vector.shape_cast %106 : vector<1x16x1xf32> to vector<16x1xf32>
    %108 = vector.broadcast %107 : vector<16x1xf32> to vector<16x256xf32>
    %109 = arith.mulf %100, %108 : vector<16x256xf32>
    %110 = arith.addf %95, %109 : vector<16x256xf32>
    %c240_i32 = arith.constant 240 : i32
    %111 = tpu.dynamic_rotate %8 by %c240_i32 dim 1 : vector<16x256xf32>, i32 -> vector<16x256xf32>
    %c7 = arith.constant 7 : index
    %c0_63 = arith.constant 0 : index
    %c0_64 = arith.constant 0 : index
    %112 = vector.load %arg6[%c7, %c0_63, %c0_64] : memref<9x1x256xf32, #tpu.memory_space<vmem>>, vector<1x1x256xf32>
    %113 = vector.shape_cast %112 : vector<1x1x256xf32> to vector<1x256xf32>
    %114 = vector.broadcast %113 : vector<1x256xf32> to vector<16x256xf32>
    %115 = arith.mulf %111, %114 : vector<16x256xf32>
    %c7_65 = arith.constant 7 : index
    %c0_66 = arith.constant 0 : index
    %c0_67 = arith.constant 0 : index
    %116 = vector.load %arg4[%c7_65, %c0_66, %c0_67] : memref<9x16x1xf32, #tpu.memory_space<vmem>>, vector<1x16x1xf32>
    %117 = vector.shape_cast %116 : vector<1x16x1xf32> to vector<16x1xf32>
    %118 = vector.broadcast %117 : vector<16x1xf32> to vector<16x256xf32>
    %119 = arith.mulf %115, %118 : vector<16x256xf32>
    %120 = arith.addf %105, %119 : vector<16x256xf32>
    %c7_68 = arith.constant 7 : index
    %c0_69 = arith.constant 0 : index
    %c0_70 = arith.constant 0 : index
    %121 = vector.load %arg5[%c7_68, %c0_69, %c0_70] : memref<9x16x1xf32, #tpu.memory_space<vmem>>, vector<1x16x1xf32>
    %122 = vector.shape_cast %121 : vector<1x16x1xf32> to vector<16x1xf32>
    %123 = vector.broadcast %122 : vector<16x1xf32> to vector<16x256xf32>
    %124 = arith.mulf %115, %123 : vector<16x256xf32>
    %125 = arith.addf %110, %124 : vector<16x256xf32>
    %c239_i32 = arith.constant 239 : i32
    %126 = tpu.dynamic_rotate %8 by %c239_i32 dim 1 : vector<16x256xf32>, i32 -> vector<16x256xf32>
    %c8 = arith.constant 8 : index
    %c0_71 = arith.constant 0 : index
    %c0_72 = arith.constant 0 : index
    %127 = vector.load %arg6[%c8, %c0_71, %c0_72] : memref<9x1x256xf32, #tpu.memory_space<vmem>>, vector<1x1x256xf32>
    %128 = vector.shape_cast %127 : vector<1x1x256xf32> to vector<1x256xf32>
    %129 = vector.broadcast %128 : vector<1x256xf32> to vector<16x256xf32>
    %130 = arith.mulf %126, %129 : vector<16x256xf32>
    %c8_73 = arith.constant 8 : index
    %c0_74 = arith.constant 0 : index
    %c0_75 = arith.constant 0 : index
    %131 = vector.load %arg4[%c8_73, %c0_74, %c0_75] : memref<9x16x1xf32, #tpu.memory_space<vmem>>, vector<1x16x1xf32>
    %132 = vector.shape_cast %131 : vector<1x16x1xf32> to vector<16x1xf32>
    %133 = vector.broadcast %132 : vector<16x1xf32> to vector<16x256xf32>
    %134 = arith.mulf %130, %133 : vector<16x256xf32>
    %135 = arith.addf %120, %134 : vector<16x256xf32>
    %c8_76 = arith.constant 8 : index
    %c0_77 = arith.constant 0 : index
    %c0_78 = arith.constant 0 : index
    %136 = vector.load %arg5[%c8_76, %c0_77, %c0_78] : memref<9x16x1xf32, #tpu.memory_space<vmem>>, vector<1x16x1xf32>
    %137 = vector.shape_cast %136 : vector<1x16x1xf32> to vector<16x1xf32>
    %138 = vector.broadcast %137 : vector<16x1xf32> to vector<16x256xf32>
    %139 = arith.mulf %130, %138 : vector<16x256xf32>
    %140 = arith.addf %125, %139 : vector<16x256xf32>
    %cst_79 = arith.constant 0.000000e+00 : f32
    %141 = vector.broadcast %cst_79 : f32 to vector<16x256xf32>
    %142 = arith.maximumf %135, %141 : vector<16x256xf32>
    %cst_80 = arith.constant 0.000000e+00 : f32
    %143 = vector.broadcast %cst_80 : f32 to vector<16x256xf32>
    %144 = arith.maximumf %140, %143 : vector<16x256xf32>
    %145 = arith.mulf %142, %144 : vector<16x256xf32>
    %c0_81 = arith.constant 0 : index
    %c0_82 = arith.constant 0 : index
    %146 = vector.load %arg7[%c0_81, %c0_82] : memref<8x16xf32, #tpu.memory_space<vmem>>, vector<8x16xf32>
    %cst_83 = arith.constant dense<0.000000e+00> : vector<8x256xf32>
    %147 = tpu.matmul %146, %145, %cst_83 {dimension_numbers = #tpu.dot_dimension_numbers<[1], [0], [0], [1], [0, 0, 1, 1], [], []>} : vector<8x16xf32>, vector<16x256xf32>, vector<8x256xf32> -> vector<8x256xf32>
    %c0_84 = arith.constant 0 : index
    %c0_85 = arith.constant 0 : index
    %148 = vector.load %arg8[%c0_84, %c0_85] : memref<8x1xf32, #tpu.memory_space<vmem>>, vector<8x1xf32>
    %149 = vector.broadcast %148 : vector<8x1xf32> to vector<8x256xf32>
    %150 = arith.addf %147, %149 : vector<8x256xf32>
    %cst_86 = arith.constant 0.000000e+00 : f32
    %151 = vector.broadcast %cst_86 : f32 to vector<8x256xf32>
    %152 = arith.maximumf %150, %151 : vector<8x256xf32>
    %c0_87 = arith.constant 0 : index
    %c0_88 = arith.constant 0 : index
    %c0_89 = arith.constant 0 : index
    %153 = vector.load %arg9[%c0_87, %c0_88, %c0_89] : memref<1x8x256xf32, #tpu.memory_space<vmem>>, vector<1x8x256xf32>
    %154 = vector.shape_cast %153 : vector<1x8x256xf32> to vector<8x256xf32>
    %155 = vector.shape_cast %152 : vector<8x256xf32> to vector<1x8x256xf32>
    tpu.vector_store %arg9[%c0_87, %c0_88, %c0_89], %155 {strides = array<i32>} : memref<1x8x256xf32, #tpu.memory_space<vmem>>, vector<1x8x256xf32>,
    return
  }
  func.func @transform_0(%arg0: i32) -> (i32, i32, i32) {
    %c0_i32 = arith.constant 0 : i32
    %c0_i32_0 = arith.constant 0 : i32
    %c0_i32_1 = arith.constant 0 : i32
    return %arg0, %c0_i32, %c0_i32_0 : i32, i32, i32
  }
  func.func @transform_1(%arg0: i32) -> (i32, i32) {
    %c0_i32 = arith.constant 0 : i32
    %c0_i32_0 = arith.constant 0 : i32
    %c0_i32_1 = arith.constant 0 : i32
    return %c0_i32, %c0_i32_0 : i32, i32
  }
  func.func @transform_2(%arg0: i32) -> (i32, i32) {
    %c0_i32 = arith.constant 0 : i32
    %c0_i32_0 = arith.constant 0 : i32
    %c0_i32_1 = arith.constant 0 : i32
    return %c0_i32, %c0_i32_0 : i32, i32
  }
  func.func @transform_3(%arg0: i32) -> (i32, i32, i32) {
    %c0_i32 = arith.constant 0 : i32
    %c0_i32_0 = arith.constant 0 : i32
    %c0_i32_1 = arith.constant 0 : i32
    %c0_i32_2 = arith.constant 0 : i32
    return %c0_i32, %c0_i32_0, %c0_i32_1 : i32, i32, i32
  }
  func.func @transform_4(%arg0: i32) -> (i32, i32, i32) {
    %c0_i32 = arith.constant 0 : i32
    %c0_i32_0 = arith.constant 0 : i32
    %c0_i32_1 = arith.constant 0 : i32
    %c0_i32_2 = arith.constant 0 : i32
    return %c0_i32, %c0_i32_0, %c0_i32_1 : i32, i32, i32
  }
  func.func @transform_5(%arg0: i32) -> (i32, i32, i32) {
    %c0_i32 = arith.constant 0 : i32
    %c0_i32_0 = arith.constant 0 : i32
    %c0_i32_1 = arith.constant 0 : i32
    %c0_i32_2 = arith.constant 0 : i32
    return %c0_i32, %c0_i32_0, %c0_i32_1 : i32, i32, i32
  }
  func.func @transform_6(%arg0: i32) -> (i32, i32) {
    %c0_i32 = arith.constant 0 : i32
    %c0_i32_0 = arith.constant 0 : i32
    %c0_i32_1 = arith.constant 0 : i32
    return %c0_i32, %c0_i32_0 : i32, i32
  }
  func.func @transform_7(%arg0: i32) -> (i32, i32) {
    %c0_i32 = arith.constant 0 : i32
    %c0_i32_0 = arith.constant 0 : i32
    %c0_i32_1 = arith.constant 0 : i32
    return %c0_i32, %c0_i32_0 : i32, i32
  }
  func.func @transform_8(%arg0: i32) -> (i32, i32, i32) {
    %c0_i32 = arith.constant 0 : i32
    %c0_i32_0 = arith.constant 0 : i32
    %c0_i32_1 = arith.constant 0 : i32
    return %arg0, %c0_i32, %c0_i32_0 : i32, i32, i32
  }
}

</mosaic_0001>

<bundles_post_ra>
// kernel: tpu_custom_call.1
= control target key start
LH: loop header
LB: loop body
LE: loop exit
PB: predicated region body
PF: predicated region fallthrough
CT: control target
= control target key end

     0   :  { %13 = vsyncpa [#allocation3], 0  ;;  %s2017_s0 = inlined_call_operand.vmem [shape: f32[2,4,256], index: 0, kind: input, shape index: {}]   ;;  %s2018_s1 = inlined_call_operand.vmem [shape: f32[16,4], index: 1, kind: input, shape index: {}]   ;;  %s2019_s2 = inlined_call_operand.vmem [shape: f32[16,1], index: 2, kind: input, shape index: {}]   ;;  %s2020_s3 = inlined_call_operand.vmem [shape: f32[9,16,1], index: 3, kind: input, shape index: {}]   ;;  %s2021_s4 = inlined_call_operand.vmem [shape: f32[9,16,1], index: 4, kind: input, shape index: {}]   ;;  %s2022_s5 = inlined_call_operand.vmem [shape: f32[9,1,256], index: 5, kind: input, shape index: {}]   ;;  %s2023_s6 = inlined_call_operand.vmem [shape: f32[8,16], index: 6, kind: input, shape index: {}]   ;;  %s2024_s7 = inlined_call_operand.vmem [shape: f32[8,1], index: 7, kind: input, shape index: {}]   ;;  %s2025_s8 = inlined_call_operand.hbm [shape: f32[2,8,256], index: 8, kind: output, shape index: {}]  }
   0x1   :  { %15 = vsyncpa [#allocation3 + $0x1], 0  ;;  %s1437_s27 = smov 0   ;;  %s1439_s28 = smov 0  }
   0x2   :  { %s1441_s29 = smov 0   ;;  %s1443_s30 = smov 0  }
   0x3 LB: > { %s1458_s9 = sadd.s32 4294967295, %s1379_s30   ;;  %s1203_s10 = sadd.s32 4294967294, %s1379_s30   ;;  %s1379_s30 = sphi %s1443_s30, %s2106_s30   ;;  %s1375_s29 = sphi %s1441_s29, %s2105_s29   ;;  %s1371_s28 = sphi %s1439_s28, %s2104_s28   ;;  %s1367_s27 = sphi %s1437_s27, %s2103_s27  }
   0x4   : > { %s1462_s11 = sadd.s32 1, %s1379_s30   ;;  %s201_s12 = sadd.s32 1, %s1375_s29 }
   0x5   : > { %s198_s13 = ssub.s32 %s1379_s30, %s1462_s11  ;;  %p211_p0 = scmp.ne.s32.totalorder %s1375_s29, %s1371_s28 }
   0x6   : > { %p199_p1 = scmp.eq.s32.totalorder %s198_s13, 0  ;;  %p212_p2 = scmp.eq.s32.totalorder %s1458_s9, 1 }
   0x7   : > { %p217_p3 = scmp.ne.s32.totalorder %s1371_s28, %s1367_s27  ;;  %p218_p4 = scmp.eq.s32.totalorder %s1203_s10, 1 }
   0x8   : > { %s1473_s14 = scalar_select %p199_p1, %s1375_s29, %s201_s12  }
   0x9   : > { %p1475_p5 = por %p212_p2, %p211_p0  ;;  %p1479_p6 = por %p218_p4, %p217_p3 }
   0xa   : > { %p1206_p7 = scmp.ge.s32.totalorder %s1379_s30, 1  ;;  %p265_p8 = scmp.lt.s32.totalorder %s1379_s30, 3 }
   0xc   : > { %p266_p9 = pnand %p1206_p7, %p265_p8 }
   0xe   : > { %269 = sbr.rel (%p266_p9) target bundleno = 688 (0x2b0), region = 52 }
  0x15   : > { %p299_p10 = scmp.lt.s32.totalorder %s1458_s9, 1  ;;  %v1381_v0 = vmov 0.0   ;;  %v307_v1 = vld [vmem:[%s2019_s2] sm:$0xff]  ;;  %v1382_v2 = vmov 0   ;;  %v308_v3 = vld [vmem:[%s2019_s2 + $0x8] sm:$0xff]  ;;  %vm328_vm0 = vcmask 1043456  }
  0x16   : > { %397 = vmatprep.mubr.f32.mxu0 %v1381_v0  ;;  %1118 = vmatprep.mubr.f32.mxu1 %v1381_v0  ;;  %v445_v4 = vld [vmem:[%s2020_s3] sm:$0xff]  ;;  %v446_v6 = vld [vmem:[%s2020_s3 + $0x8] sm:$0xff]  ;;  %vm321_vm1 = vcmask 31744   ;;  %v1215_v12 = vld [vmem:[%s2020_s3 + $0x10] sm:$0xff]  ;;  %s1383_s24 = smov 17   ;;  %s1384_s25 = smov 16  }
  0x17   : > { %s300_s19 = scalar_select %p299_p10, %s1458_s9, 1  ;;  %1314 = vset.pattern.permute.xlu0 %v1382_v2  ;;  %1315 = vset.pattern.permute.xlu1 %v1382_v2  ;;  %v305_v8 = vld [vmem:[%s2018_s1] sm:$0xff]  ;;  %v466_v10 = vld [vmem:[%s2021_s4 + $0x8] sm:$0xff]  ;;  %v1216_v13 = vld [vmem:[%s2020_s3 + $0x18] sm:$0xff]  ;;  %vm1050_vm10 = vcmask 130048  }
  0x18   : > { %311 = vperm.xlu0 %1314, %v307_v1   ;;  %449 = vperm.xlu1 %1315, %v445_v4   ;;  %v465_v9 = vld [vmem:[%s2021_s4] sm:$0xff]  ;;  %v306_v11 = vld [vmem:[%s2018_s1 + $0x8] sm:$0xff]  ;;  %v1217_v14 = vld [vmem:[%s2021_s4 + $0x10] sm:$0xff]  ;;  %s1385_s26 = smov 15   ;;  %s1387_s12 = smov 127  }
  0x19   : > { %s1259_s20 = sshll.u32 %s300_s19, 3  ;;  %v1218_v15 = vld [vmem:[%s2021_s4 + $0x18] sm:$0xff]  ;;  %v1220_v16 = vld [vmem:[%s2020_s3 + $0x20] sm:$0xff]  ;;  %v1221_v17 = vld [vmem:[%s2020_s3 + $0x28] sm:$0xff]  ;;  %s1388_s13 = smov 113  }
  0x1a   : > { %s303_s10 = scalar_lea.vmem %s2017_s0, %s1259_s20  ;;  %v1222_v18 = vld [vmem:[%s2021_s4 + $0x20] sm:$0xff]  ;;  %v1223_v19 = vld [vmem:[%s2021_s4 + $0x28] sm:$0xff]  ;;  %v1225_v20 = vld [vmem:[%s2020_s3 + $0x30] sm:$0xff]  ;;  %s1389_s17 = smov 112  }
  0x1b   : > { %v304_v5 = vld [vmem:[%s303_s10] sm:$0xff]  ;;  %v1226_v21 = vld [vmem:[%s2020_s3 + $0x38] sm:$0xff]  ;;  %v1227_v22 = vld [vmem:[%s2021_s4 + $0x30] sm:$0xff]  ;;  %s1386_s10 = smov 1   ;;  %s1390_s18 = smov 111  }
  0x1c   : > { %v320_v7 = vcombine.high %v304_v5, %v304_v5  ;;  %316 = vperm.xlu0 %1314, %v308_v3   ;;  %454 = vperm.xlu1 %1315, %v446_v6   ;;  %v1228_v23 = vld [vmem:[%s2021_s4 + $0x38] sm:$0xff]  ;;  %v1229_v24 = vld [vmem:[%s2020_s3 + $0x40] sm:$0xff]  ;;  %v1230_v25 = vld [vmem:[%s2020_s3 + $0x48] sm:$0xff] }
  0x1d   : > { %v1231_v26 = vld [vmem:[%s2021_s4 + $0x40] sm:$0xff]  ;;  %v1232_v27 = vld [vmem:[%s2021_s4 + $0x48] sm:$0xff]  ;;  %v1234_v28 = vld [vmem:[%s2020_s3 + $0x50] sm:$0xff] }
  0x1e   : > { %1210 = vmatprep.subr.msk.mxu0 %vm328_vm0, %v320_v7  ;;  %v1235_v29 = vld [vmem:[%s2020_s3 + $0x58] sm:$0xff]  ;;  %v1236_v30 = vld [vmem:[%s2021_s4 + $0x50] sm:$0xff]  ;;  %v1239_v32 = vld [vmem:[%s2020_s3 + $0x60] sm:$0xff] }
  0x1f   : > { %1211 = vmatpush1.msk.msra.mxu0 %vm328_vm0, %v304_v5  ;;  %v1237_v31 = vld [vmem:[%s2021_s4 + $0x58] sm:$0xff]  ;;  %v1240_v33 = vld [vmem:[%s2020_s3 + $0x68] sm:$0xff]  ;;  %v1241_v34 = vld [vmem:[%s2021_s4 + $0x60] sm:$0xff] }
  0x20   : > { %1212 = vmatmul.mubr.msk.f32.vlgmr.msra.gmra.mrb[0].mxu0 %vm321_vm1, %v305_v8  ;;  %469 = vperm.xlu0 %1314, %v465_v9   ;;  %v1242_v35 = vld [vmem:[%s2021_s4 + $0x68] sm:$0xff]  ;;  %v1244_v36 = vld [vmem:[%s2020_s3 + $0x70] sm:$0xff]  ;;  %v1245_v37 = vld [vmem:[%s2020_s3 + $0x78] sm:$0xff] }
  0x21   : > { %403 = vmatprep.mubr.f32.mxu0 %v1381_v0  ;;  %474 = vperm.xlu1 %1315, %v466_v10   ;;  %v1246_v38 = vld [vmem:[%s2021_s4 + $0x70] sm:$0xff]  ;;  %v1247_v39 = vld [vmem:[%s2021_s4 + $0x78] sm:$0xff]  ;;  %v1249_v40 = vld [vmem:[%s2020_s3 + $0x80] sm:$0xff] }
  0x22   : > { %v1250_v41 = vld [vmem:[%s2020_s3 + $0x88] sm:$0xff]  ;;  %v1251_v42 = vld [vmem:[%s2021_s4 + $0x80] sm:$0xff] }
  0x23   : > { %v1252_v43 = vld [vmem:[%s2021_s4 + $0x88] sm:$0xff] }
  0x24   : > { %1213 = vmatmul.mubr.msk.f32.gmra.mrb[2].mxu0 %vm321_vm1, %v306_v11  ;;  %520 = vperm.xlu0 %1314, %v1215_v12  }
  0x25   : > { %525 = vperm.xlu1 %1315, %v1216_v13  }
  0x28   : > { %541 = vperm.xlu0 %1314, %v1217_v14  }
  0x29   : > { %546 = vperm.xlu1 %1315, %v1218_v15  }
  0x2c   : > { %592 = vperm.xlu0 %1314, %v1220_v16  }
  0x2d   : > { %597 = vperm.xlu1 %1315, %v1221_v17  }
  0x30   : > { %613 = vperm.xlu0 %1314, %v1222_v18  }
  0x31   : > { %618 = vperm.xlu1 %1315, %v1223_v19  }
  0x34   : > { %664 = vperm.xlu0 %1314, %v1225_v20  }
  0x35   : > { %669 = vperm.xlu1 %1315, %v1226_v21  }
  0x38   : > { %685 = vperm.xlu0 %1314, %v1227_v22   ;;  %v1044_v22 = vld [vmem:[%s2024_s7] sm:$0xff] }
  0x39   : > { %690 = vperm.xlu1 %1315, %v1228_v23  }
  0x3c   : > { %706 = vperm.xlu0 %1314, %v1229_v24  }
  0x3d   : > { %711 = vperm.xlu1 %1315, %v1230_v25  }
  0x40   : > { %727 = vperm.xlu0 %1314, %v1231_v26  }
  0x41   : > { %732 = vperm.xlu1 %1315, %v1232_v27  }
  0x44   : > { %778 = vperm.xlu0 %1314, %v1234_v28  }
  0x45   : > { %783 = vperm.xlu1 %1315, %v1235_v29  }
  0x48   : > { %799 = vperm.xlu0 %1314, %v1236_v30  }
  0x49   : > { %804 = vperm.xlu1 %1315, %v1237_v31  }
  0x4c   : > { %850 = vperm.xlu0 %1314, %v1239_v32  }
  0x4d   : > { %855 = vperm.xlu1 %1315, %v1240_v33  }
  0x50   : > { %871 = vperm.xlu0 %1314, %v1241_v34  }
  0x51   : > { %876 = vperm.xlu1 %1315, %v1242_v35  }
  0x54   : > { %922 = vperm.xlu0 %1314, %v1244_v36  }
  0x55   : > { %927 = vperm.xlu1 %1315, %v1245_v37  }
  0x58   : > { %943 = vperm.xlu0 %1314, %v1246_v38  }
  0x59   : > { %948 = vperm.xlu1 %1315, %v1247_v39  }
  0x5c   : > { %994 = vperm.xlu0 %1314, %v1249_v40  }
  0x5d   : > { %999 = vperm.xlu1 %1315, %v1250_v41  }
  0x60   : > { %1015 = vperm.xlu0 %1314, %v1251_v42  }
  0x61   : > { %1020 = vperm.xlu1 %1315, %v1252_v43  }
  0x97   : > { %v312_v44 = vpop.permute.xlu0 %311  ;;  %v1610_v45 = vpop.permute.xlu1 %449 }
  0x9b   : > { %v317_v46 = vpop.permute.xlu0 %316  ;;  %v1612_v47 = vpop.permute.xlu1 %454 }
  0x9f   : > { %v1614_v48 = vpop.permute.xlu0 %469 }
  0xa0   : > { %v1616_v49 = vpop.permute.xlu1 %474 }
  0xa3   : > { %v1618_v50 = vpop.permute.xlu0 %520 }
  0xa4   : > { %v1620_v51 = vpop.permute.xlu1 %525 }
  0xa7   : > { %v1622_v52 = vpop.permute.xlu0 %541 }
  0xa8   : > { %v1624_v53 = vpop.permute.xlu1 %546 }
  0xab   : > { %v1626_v54 = vpop.permute.xlu0 %592 }
  0xac   : > { %v1628_v55 = vpop.permute.xlu1 %597 }
  0xaf   : > { %v1630_v56 = vpop.permute.xlu0 %613 }
  0xb0   : > { %v1632_v57 = vpop.permute.xlu1 %618 }
  0xb3   : > { %v1634_v58 = vpop.permute.xlu0 %664 }
  0xb4   : > { %v1636_v59 = vpop.permute.xlu1 %669 }
  0xb7   : > { %v1638_v60 = vpop.permute.xlu0 %685 }
  0xb8   : > { %v1640_v61 = vpop.permute.xlu1 %690 }
  0xbb   : > { %v707_v62 = vpop.permute.xlu0 %706 }
  0xbc   : > { %v712_v0 = vpop.permute.xlu1 %711 }
  0xbf   : > { %v728_v5 = vpop.permute.xlu0 %727 }
  0xc0   : > { %v733_v13 = vpop.permute.xlu1 %732 }
  0xc3   : > { %v1665_v23 = vpop.permute.xlu0 %778 }
  0xc4   : > { %v1667_v24 = vpop.permute.xlu1 %783 }
  0xc5   : > { %2053 = vst [vmem:[#allocation5_spill] sm:$0xff] %v1667_v24 }
  0xc7   : > { %v1669_v25 = vpop.permute.xlu0 %799 }
  0xc8   : > { %v1671_v26 = vpop.permute.xlu1 %804 }
  0xc9   : > { %2054 = vst [vmem:[#allocation6_spill] sm:$0xff] %v1671_v26 }
  0xcb   : > { %v1673_v27 = vpop.permute.xlu0 %850 }
  0xcc   : > { %2055 = vst [vmem:[#allocation7_spill] sm:$0xff] %v1673_v27  ;;  %v1675_v28 = vpop.permute.xlu1 %855 }
  0xcd   : > { %2056 = vst [vmem:[#allocation8_spill] sm:$0xff] %v1675_v28 }
  0xcf   : > { %v1677_v29 = vpop.permute.xlu0 %871 }
  0xd0   : > { %2057 = vst [vmem:[#allocation9_spill] sm:$0xff] %v1677_v29  ;;  %v1679_v30 = vpop.permute.xlu1 %876 }
  0xd1   : > { %2058 = vst [vmem:[#allocation10_spill] sm:$0xff] %v1679_v30  ;;  %v1248_v30 = vld [vmem:[%s2022_s5 + $0x10] sm:$0x3] }
  0xd3   : > { %v1681_v31 = vpop.permute.xlu0 %922 }
  0xd4   : > { %2059 = vst [vmem:[#allocation11_spill] sm:$0xff] %v1681_v31  ;;  %v1683_v32 = vpop.permute.xlu1 %927 }
  0xd5   : > { %2060 = vst [vmem:[#allocation12_spill] sm:$0xff] %v1683_v32 }
  0xd7   : > { %v1685_v33 = vpop.permute.xlu0 %943 }
  0xd8   : > { %2061 = vst [vmem:[#allocation13_spill] sm:$0xff] %v1685_v33  ;;  %v1687_v34 = vpop.permute.xlu1 %948 }
  0xd9   : > { %2062 = vst [vmem:[#allocation14_spill] sm:$0xff] %v1687_v34 }
  0xdb   : > { %v1689_v35 = vpop.permute.xlu0 %994 }
  0xdc   : > { %2063 = vst [vmem:[#allocation15_spill] sm:$0xff] %v1689_v35  ;;  %v1691_v36 = vpop.permute.xlu1 %999 }
  0xdd   : > { %2064 = vst [vmem:[#allocation16_spill] sm:$0xff] %v1691_v36 }
  0xdf   : > { %v1693_v37 = vpop.permute.xlu0 %1015 }
  0xe0   : > { %2065 = vst [vmem:[#allocation17_spill] sm:$0xff] %v1693_v37  ;;  %v1695_v38 = vpop.permute.xlu1 %1020 }
  0xe1   : > { %2066 = vst [vmem:[#allocation18_spill] sm:$0xff] %v1695_v38  ;;  %v1233_v38 = vld [vmem:[%s2022_s5 + $0xa] sm:$0x3] }
  0xf3   : > { %v399_v63 = vpop.f32.mrb[0].mxu0 }
  0xf4   : > { %v400_v1 = vadd.f32 %v399_v63, %v312_v44  ;;  %v401_v2 = vpop.f32.mrb[1].mxu0 }
  0xf5   : > { %v402_v3 = vadd.f32 %v401_v2, %v312_v44 }
  0xf6   : > { %v410_v4 = vmax.f32 %v400_v1, 0.0 }
  0xf7   : > { %v411_v6 = vmax.f32 %v402_v3, 0.0  ;;  %v405_v7 = vpop.f32.mrb[2].mxu0 }
  0xf8   : > { %v406_v8 = vadd.f32 %v405_v7, %v317_v46  ;;  %v407_v9 = vpop.f32.mrb[3].mxu0  ;;  %414 = vrot.lane.b32.xlu0 %v410_v4, %s1383_s24  ;;  %v1643_v10 = vmul.f32 %v707_v62, %v410_v4  ;;  %v1645_v11 = vmul.f32 %v728_v5, %v410_v4 }
  0xf9   : > { %v408_v12 = vadd.f32 %v407_v9, %v317_v46  ;;  %v1647_v14 = vmul.f32 %v707_v62, %v411_v6  ;;  %v1649_v15 = vmul.f32 %v728_v5, %v411_v6 }
  0xfa   : > { %v412_v16 = vmax.f32 %v406_v8, 0.0 }
  0xfb   : > { %v413_v17 = vmax.f32 %v408_v12, 0.0 }
  0xfc   : > { %v1651_v18 = vmul.f32 %v733_v13, %v412_v16  ;;  %416 = vrot.lane.b32.xlu1 %v412_v16, %s1383_s24  ;;  %485 = vrot.lane.b32.xlu0 %v410_v4, %s1384_s25  ;;  %v1654_v19 = vmul.f32 %v712_v0, %v412_v16 }
  0xfd   : > { %v1656_v20 = vmul.f32 %v733_v13, %v413_v17  ;;  %v1658_v21 = vmul.f32 %v712_v0, %v413_v17  ;;  %v422_v0 = vlaneseq  ;;  %v429_v13 = vld [vmem:[%s2022_s5] sm:$0x3] }
  0xff   : > { %v432_v3 = vshrl.u32 %v422_v0, 7 }
 0x100   : > { %487 = vrot.lane.b32.xlu1 %v412_v16, %s1384_s25  ;;  %557 = vrot.lane.b32.xlu0 %v410_v4, %s1385_s26 }
 0x101   : > { %v433_v7 = vsub.s32 0, %v432_v3  ;;  %v437_v8 = vsub.s32 1, %v432_v3  ;;  %v1224_v3 = vld [vmem:[%s2022_s5 + $0x6] sm:$0x3] }
 0x103   : > { %v1761_v28 = vrot.slane %v1224_v3, %v433_v7 }
 0x104   : > { %559 = vrot.lane.b32.xlu1 %v412_v16, %s1385_s26  ;;  %629 = vrot.lane.b32.xlu0 %v410_v4, %s1386_s10 }
 0x108   : > { %631 = vrot.lane.b32.xlu1 %v412_v16, %s1386_s10  ;;  %743 = vrot.lane.b32.xlu0 %v410_v4, %s1387_s12 }
 0x10c   : > { %745 = vrot.lane.b32.xlu1 %v412_v16, %s1387_s12  ;;  %815 = vrot.lane.b32.xlu0 %v410_v4, %s1388_s13 }
 0x110   : > { %817 = vrot.lane.b32.xlu1 %v412_v16, %s1388_s13  ;;  %887 = vrot.lane.b32.xlu0 %v410_v4, %s1389_s17 }
 0x114   : > { %889 = vrot.lane.b32.xlu1 %v412_v16, %s1389_s17  ;;  %959 = vrot.lane.b32.xlu0 %v410_v4, %s1390_s18 }
 0x118   : > { %961 = vrot.lane.b32.xlu1 %v412_v16, %s1390_s18  ;;  %418 = vrot.lane.b32.xlu0 %v411_v6, %s1383_s24  ;;  %v1214_v16 = vld [vmem:[%s2022_s5 + $0x2] sm:$0x3] }
 0x119   : > { %v504_v35 = vrot.slane %v1214_v16, %v433_v7  ;;  %v508_v34 = vrot.slane %v1214_v16, %v437_v8  ;;  %v1243_v16 = vld [vmem:[%s2022_s5 + $0xe] sm:$0x3] }
 0x11c   : > { %420 = vrot.lane.b32.xlu1 %v413_v17, %s1383_s24  ;;  %489 = vrot.lane.b32.xlu0 %v411_v6, %s1384_s25 }
 0x120   : > { %491 = vrot.lane.b32.xlu1 %v413_v17, %s1384_s25  ;;  %561 = vrot.lane.b32.xlu0 %v411_v6, %s1385_s26 }
 0x124   : > { %563 = vrot.lane.b32.xlu1 %v413_v17, %s1385_s26  ;;  %633 = vrot.lane.b32.xlu0 %v411_v6, %s1386_s10  ;;  %s296_s26 = sand.u32 1, %s1371_s28  }
 0x125   : > { %s1130_s20 = scalar_lea.sflag [#allocation3], %s296_s26 }
 0x128   : > { %635 = vrot.lane.b32.xlu1 %v413_v17, %s1386_s10  ;;  %747 = vrot.lane.b32.xlu0 %v411_v6, %s1387_s12  ;;  %s1207_s10 = sshll.u32 %s296_s26, 4 }
 0x12c   : > { %749 = vrot.lane.b32.xlu1 %v413_v17, %s1387_s12  ;;  %819 = vrot.lane.b32.xlu0 %v411_v6, %s1388_s13  ;;  %s1260_s12 = sshll.u32 %s1458_s9, 8  ;;  %s1391_s9 = smov [#allocation2]  }
 0x12d   : > { %s1975_s21 = scalar_lea.hbm %s2025_s8, %s1260_s12  ;;  %s1321_s23 = sshll.u32 %s1391_s9, 4  ;;  %s1322_s23 = int_to_ptr.vmem [resolvable:$false] %s1321_s23 }
 0x12e   : > { %s1323_s24 = scalar_lea.vmem %s1322_s23, 512 }
 0x130   : > { %821 = vrot.lane.b32.xlu1 %v413_v17, %s1388_s13  ;;  %891 = vrot.lane.b32.xlu0 %v411_v6, %s1389_s17  ;;  %s298_s13 = scalar_lea.vmem [#allocation2], %s1207_s10 }
 0x134   : > { %893 = vrot.lane.b32.xlu1 %v413_v17, %s1389_s17  ;;  %963 = vrot.lane.b32.xlu0 %v411_v6, %s1390_s18  ;;  %v1717_v6 = vand.u32 127, %v422_v0  ;;  %v438_v0 = vrot.slane %v429_v13, %v437_v8  ;;  %s1144_s17 = sshll.u32 %s298_s13, 4  ;;  %s1977_s17 = int_to_ptr.vmem [resolvable:$true] %s1144_s17 }
 0x135   : > { %s1317_s22 = scalar_lea.vmem %s1977_s17, 256  ;;  %p1324_p0 = scmp.lt.s32.totalorder %s1977_s17, %s1322_s23 }
 0x136   : > { %vm424_vm2 = vcmp.lt.s32.totalorder %v1717_v6, 17  ;;  %vm493_vm3 = vcmp.lt.s32.totalorder %v1717_v6, 16  ;;  %vm565_vm4 = vcmp.lt.s32.totalorder %v1717_v6, 15  ;;  %vm637_vm5 = vcmp.lt.s32.totalorder %v1717_v6, 1  ;;  %p1318_p11 = scmp.ne.s32.totalorder %s1977_s17, %s1317_s22  ;;  %p1325_p1 = scmp.lt.s32.totalorder %s1323_s24, %s1317_s22 }
 0x137   : > { %vm751_vm6 = vcmp.lt.s32.totalorder %v1717_v6, 127  ;;  %vm823_vm7 = vcmp.lt.s32.totalorder %v1717_v6, 113  ;;  %vm895_vm8 = vcmp.lt.s32.totalorder %v1717_v6, 112  ;;  %vm967_vm9 = vcmp.lt.s32.totalorder %v1717_v6, 111 }
 0x138   : > { %965 = vrot.lane.b32.xlu1 %v413_v17, %s1390_s18  ;;  %1047 = vperm.xlu0 %1314, %v1044_v22   ;;  %v1219_v17 = vld [vmem:[%s2022_s5 + $0x4] sm:$0x3]  ;;  %v434_v22 = vrot.slane %v429_v13, %v433_v7  ;;  %v1238_v13 = vld [vmem:[%s2022_s5 + $0xc] sm:$0x3]  ;;  %p1319_p12 = pnand %p1318_p11, %p1475_p5  ;;  %p1326_p2 = por %p1325_p1, %p1324_p0 }
 0x139   : > { %v1750_v31 = vrot.slane %v1219_v17, %v433_v7  ;;  %v1769_v29 = vrot.slane %v1238_v13, %v433_v7  ;;  %v1771_v27 = vrot.slane %v1238_v13, %v437_v8 }
 0x13a   : > { %p1320_p13 = pneg %p1319_p12 }
 0x13b   : > { %2073 = vst [vmem:[#allocation25_spill] sm:$0xff] %v1771_v27 }
 0x13c   : > { %p1327_p3 = pnand %p1326_p2, %p1320_p13 }
 0x16a   : > { %v415_v39 = vpop.permute.xlu0 %414 }
 0x16e   : > { %v417_v40 = vpop.permute.xlu1 %416  ;;  %v486_v41 = vpop.permute.xlu0 %485 }
 0x172   : > { %v1697_v42 = vpop.permute.xlu1 %487  ;;  %v1699_v43 = vpop.permute.xlu0 %557 }
 0x176   : > { %v1701_v44 = vpop.permute.xlu1 %559  ;;  %v1703_v46 = vpop.permute.xlu0 %629 }
 0x17a   : > { %v1705_v62 = vpop.permute.xlu1 %631  ;;  %v1707_v63 = vpop.permute.xlu0 %743 }
 0x17e   : > { %v1709_v1 = vpop.permute.xlu1 %745  ;;  %v1711_v2 = vpop.permute.xlu0 %815 }
 0x17f   : > { %2067 = vst [vmem:[#allocation19_spill] sm:$0xff] %v1711_v2  ;;  %v1777_v2 = vrot.slane %v1248_v30, %v433_v7 }
 0x181   : > { %2076 = vst [vmem:[#allocation28_spill] sm:$0xff] %v1777_v2 }
 0x182   : > { %v1713_v4 = vpop.permute.xlu1 %817  ;;  %v1715_v5 = vpop.permute.xlu0 %887 }
 0x183   : > { %2068 = vst [vmem:[#allocation20_spill] sm:$0xff] %v1713_v4  ;;  %2069 = vst [vmem:[#allocation21_spill] sm:$0xff] %v1715_v5  ;;  %v1773_v5 = vrot.slane %v1243_v16, %v433_v7  ;;  %v1775_v4 = vrot.slane %v1243_v16, %v437_v8 }
 0x185   : > { %2074 = vst [vmem:[#allocation26_spill] sm:$0xff] %v1773_v5  ;;  %2075 = vst [vmem:[#allocation27_spill] sm:$0xff] %v1775_v4 }
 0x186   : > { %v1719_v9 = vpop.permute.xlu1 %889  ;;  %v1721_v12 = vpop.permute.xlu0 %959 }
 0x187   : > { %2070 = vst [vmem:[#allocation22_spill] sm:$0xff] %v1719_v9  ;;  %2071 = vst [vmem:[#allocation23_spill] sm:$0xff] %v1721_v12  ;;  %v1763_v12 = vrot.slane %v1224_v3, %v437_v8  ;;  %v1765_v9 = vrot.slane %v1233_v38, %v433_v7  ;;  %v1779_v3 = vrot.slane %v1248_v30, %v437_v8 }
 0x189   : > { %2077 = vst [vmem:[#allocation29_spill] sm:$0xff] %v1779_v3 }
 0x18a   : > { %v1739_v36 = vpop.permute.xlu1 %961  ;;  %v419_v37 = vpop.permute.xlu0 %418 }
 0x18b   : > { %2072 = vst [vmem:[#allocation24_spill] sm:$0xff] %v1739_v36  ;;  %v425_v32 = vsel %vm424_vm2, %v415_v39, %v419_v37  ;;  %v427_v33 = vsel %vm424_vm2, %v419_v37, %v415_v39  ;;  %v1752_v36 = vrot.slane %v1219_v17, %v437_v8  ;;  %v1767_v37 = vrot.slane %v1233_v38, %v437_v8 }
 0x18c   : > { %v441_v39 = vmul.f32 %v434_v22, %v427_v33  ;;  %v442_v17 = vmul.f32 %v438_v0, %v425_v32 }
 0x18e   : > { %v421_v26 = vpop.permute.xlu1 %420  ;;  %v490_v24 = vpop.permute.xlu0 %489  ;;  %v457_v7 = vmul.f32 %v1610_v45, %v441_v39  ;;  %v458_v30 = vmul.f32 %v1610_v45, %v442_v17  ;;  %v477_v8 = vmul.f32 %v1614_v48, %v441_v39  ;;  %v478_v3 = vmul.f32 %v1614_v48, %v442_v17 }
 0x18f   : > { %v426_v38 = vsel %vm424_vm2, %v417_v40, %v421_v26  ;;  %v428_v32 = vsel %vm424_vm2, %v421_v26, %v417_v40  ;;  %v494_v33 = vsel %vm493_vm3, %v486_v41, %v490_v24  ;;  %v496_v13 = vsel %vm493_vm3, %v490_v24, %v486_v41 }
 0x190   : > { %v443_v27 = vmul.f32 %v434_v22, %v428_v32  ;;  %v444_v5 = vmul.f32 %v438_v0, %v426_v38  ;;  %v511_v16 = vmul.f32 %v504_v35, %v496_v13  ;;  %v512_v4 = vmul.f32 %v508_v34, %v494_v33 }
 0x192   : > { %v459_v26 = vmul.f32 %v1612_v47, %v443_v27  ;;  %v460_v40 = vmul.f32 %v1612_v47, %v444_v5  ;;  %v479_v2 = vmul.f32 %v1616_v49, %v443_v27  ;;  %v480_v24 = vmul.f32 %v1616_v49, %v444_v5  ;;  %v492_v41 = vpop.permute.xlu1 %491  ;;  %v562_v22 = vpop.permute.xlu0 %561 }
 0x193   : > { %v528_v0 = vmul.f32 %v1618_v50, %v511_v16  ;;  %v529_v45 = vmul.f32 %v1618_v50, %v512_v4  ;;  %v549_v39 = vmul.f32 %v1622_v52, %v511_v16  ;;  %v550_v48 = vmul.f32 %v1622_v52, %v512_v4 }
 0x194   : > { %v495_v47 = vsel %vm493_vm3, %v1697_v42, %v492_v41  ;;  %v497_v49 = vsel %vm493_vm3, %v492_v41, %v1697_v42  ;;  %v566_v27 = vsel %vm565_vm4, %v1699_v43, %v562_v22  ;;  %v568_v50 = vsel %vm565_vm4, %v562_v22, %v1699_v43 }
 0x195   : > { %v532_v5 = vadd.f32 %v528_v0, %v457_v7  ;;  %v533_v17 = vadd.f32 %v529_v45, %v458_v30  ;;  %v553_v38 = vadd.f32 %v549_v39, %v477_v8  ;;  %v554_v52 = vadd.f32 %v550_v48, %v478_v3 }
 0x196   : > { %v513_v4 = vmul.f32 %v504_v35, %v497_v49  ;;  %v514_v32 = vmul.f32 %v508_v34, %v495_v47  ;;  %v583_v33 = vmul.f32 %v1750_v31, %v568_v50  ;;  %v584_v13 = vmul.f32 %v1752_v36, %v566_v27  ;;  %v564_v16 = vpop.permute.xlu1 %563  ;;  %v634_v42 = vpop.permute.xlu0 %633 }
 0x197   : > { %v567_v41 = vsel %vm565_vm4, %v1701_v44, %v564_v16  ;;  %v569_v43 = vsel %vm565_vm4, %v564_v16, %v1701_v44  ;;  %v638_v3 = vsel %vm637_vm5, %v1703_v46, %v634_v42  ;;  %v640_v34 = vsel %vm637_vm5, %v634_v42, %v1703_v46 }
 0x198   : > { %v530_v35 = vmul.f32 %v1620_v51, %v513_v4  ;;  %v531_v7 = vmul.f32 %v1620_v51, %v514_v32  ;;  %v551_v30 = vmul.f32 %v1624_v53, %v513_v4  ;;  %v552_v8 = vmul.f32 %v1624_v53, %v514_v32 }
 0x199   : > { %v600_v22 = vmul.f32 %v1626_v54, %v583_v33  ;;  %v601_v44 = vmul.f32 %v1626_v54, %v584_v13  ;;  %v621_v0 = vmul.f32 %v1630_v56, %v583_v33  ;;  %v622_v45 = vmul.f32 %v1630_v56, %v584_v13 }
 0x19a   : > { %v534_v39 = vadd.f32 %v530_v35, %v459_v26  ;;  %v535_v48 = vadd.f32 %v531_v7, %v460_v40  ;;  %v555_v47 = vadd.f32 %v551_v30, %v479_v2  ;;  %v556_v46 = vadd.f32 %v552_v8, %v480_v24  ;;  %v636_v49 = vpop.permute.xlu1 %635  ;;  %v748_v27 = vpop.permute.xlu0 %747 }
 0x19b   : > { %v604_v50 = vadd.f32 %v600_v22, %v532_v5  ;;  %v605_v51 = vadd.f32 %v601_v44, %v533_v17  ;;  %v625_v16 = vadd.f32 %v621_v0, %v553_v38  ;;  %v626_v4 = vadd.f32 %v622_v45, %v554_v52 }
 0x19c   : > { %v585_v53 = vmul.f32 %v1750_v31, %v569_v43  ;;  %v586_v32 = vmul.f32 %v1752_v36, %v567_v41  ;;  %v655_v54 = vmul.f32 %v1761_v28, %v640_v34  ;;  %v656_v33 = vmul.f32 %v1763_v12, %v638_v3 }
 0x19d   : > { %v639_v56 = vsel %vm637_vm5, %v1705_v62, %v636_v49  ;;  %v641_v2 = vsel %vm637_vm5, %v636_v49, %v1705_v62  ;;  %v752_v26 = vsel %vm751_vm6, %v1707_v63, %v748_v27  ;;  %v754_v31 = vsel %vm751_vm6, %v748_v27, %v1707_v63 }
 0x19e   : > { %v602_v36 = vmul.f32 %v1628_v55, %v585_v53  ;;  %v603_v40 = vmul.f32 %v1628_v55, %v586_v32  ;;  %v623_v24 = vmul.f32 %v1632_v57, %v585_v53  ;;  %v624_v5 = vmul.f32 %v1632_v57, %v586_v32  ;;  %v750_v34 = vpop.permute.xlu1 %749 }
 0x19f   : > { %v672_v62 = vmul.f32 %v1634_v58, %v655_v54  ;;  %v673_v17 = vmul.f32 %v1634_v58, %v656_v33  ;;  %v693_v38 = vmul.f32 %v1638_v60, %v655_v54  ;;  %v694_v52 = vmul.f32 %v1638_v60, %v656_v33  ;;  %v820_v60 = vpop.permute.xlu0 %819  ;;  %v2078_v33 = vld [vmem:[#allocation19_spill] sm:$0xff] }
 0x1a0   : > { %v606_v13 = vadd.f32 %v602_v36, %v534_v39  ;;  %v607_v63 = vadd.f32 %v603_v40, %v535_v48  ;;  %v627_v42 = vadd.f32 %v623_v24, %v555_v47  ;;  %v628_v41 = vadd.f32 %v624_v5, %v556_v46  ;;  %v2081_v40 = vld [vmem:[#allocation21_spill] sm:$0xff] }
 0x1a1   : > { %v676_v55 = vadd.f32 %v672_v62, %v604_v50  ;;  %v677_v43 = vadd.f32 %v673_v17, %v605_v51  ;;  %v697_v3 = vadd.f32 %v693_v38, %v625_v16  ;;  %v698_v57 = vadd.f32 %v694_v52, %v626_v4  ;;  %v2083_v17 = vld [vmem:[#allocation6_spill] sm:$0xff] }
 0x1a2   : > { %v657_v35 = vmul.f32 %v1761_v28, %v641_v2  ;;  %v658_v7 = vmul.f32 %v1763_v12, %v639_v56  ;;  %v769_v58 = vmul.f32 %v1765_v9, %v752_v26  ;;  %v770_v30 = vmul.f32 %v1767_v37, %v754_v31  ;;  %v822_v16 = vpop.permute.xlu1 %821  ;;  %v2079_v2 = vld [vmem:[#allocation25_spill] sm:$0xff]  ;;  %v2080_v31 = vld [vmem:[#allocation20_spill] sm:$0xff] }
 0x1a3   : > { %v719_v8 = vadd.f32 %v1647_v14, %v677_v43  ;;  %v740_v22 = vadd.f32 %v1649_v15, %v698_v57  ;;  %v718_v44 = vadd.f32 %v1643_v10, %v676_v55  ;;  %v739_v0 = vadd.f32 %v1645_v11, %v697_v3 }
 0x1a4   : > { %v674_v45 = vmul.f32 %v1636_v59, %v657_v35  ;;  %v675_v39 = vmul.f32 %v1636_v59, %v658_v7  ;;  %v695_v28 = vmul.f32 %v1640_v61, %v657_v35  ;;  %v696_v12 = vmul.f32 %v1640_v61, %v658_v7 }
 0x1a5   : > { %v786_v48 = vmul.f32 %v1665_v23, %v769_v58  ;;  %v787_v47 = vmul.f32 %v1665_v23, %v770_v30  ;;  %v807_v14 = vmul.f32 %v1669_v25, %v769_v58  ;;  %v808_v15 = vmul.f32 %v1669_v25, %v770_v30  ;;  %v892_v25 = vpop.permute.xlu0 %891 }
 0x1a6   : > { %v678_v46 = vadd.f32 %v674_v45, %v606_v13  ;;  %v679_v10 = vadd.f32 %v675_v39, %v607_v63  ;;  %v699_v49 = vadd.f32 %v695_v28, %v627_v42  ;;  %v700_v11 = vadd.f32 %v696_v12, %v628_v41  ;;  %v2084_v13 = vld [vmem:[#allocation7_spill] sm:$0xff]  ;;  %v2085_v41 = vld [vmem:[#allocation9_spill] sm:$0xff]  ;;  %v894_v3 = vpop.permute.xlu1 %893  ;;  %v2086_v45 = vld [vmem:[#allocation26_spill] sm:$0xff] }
 0x1a7   : > { %v790_v27 = vadd.f32 %v786_v48, %v718_v44  ;;  %v791_v59 = vadd.f32 %v787_v47, %v719_v8  ;;  %v811_v50 = vadd.f32 %v807_v14, %v739_v0  ;;  %v812_v51 = vadd.f32 %v808_v15, %v740_v22  ;;  %v2087_v28 = vld [vmem:[#allocation27_spill] sm:$0xff]  ;;  %v2088_v48 = vld [vmem:[#allocation22_spill] sm:$0xff] }
 0x1a8   : > { %v721_v61 = vadd.f32 %v1658_v21, %v679_v10  ;;  %v742_v4 = vadd.f32 %v1656_v20, %v700_v11  ;;  %v720_v23 = vadd.f32 %v1654_v19, %v678_v46  ;;  %v741_v53 = vadd.f32 %v1651_v18, %v699_v49  ;;  %v2089_v15 = vld [vmem:[#allocation23_spill] sm:$0xff]  ;;  %v2090_v10 = vld [vmem:[#allocation8_spill] sm:$0xff] }
 0x1a9   : > { %v753_v32 = vsel %vm751_vm6, %v1709_v1, %v750_v34  ;;  %v755_v54 = vsel %vm751_vm6, %v750_v34, %v1709_v1  ;;  %v824_v56 = vsel %vm823_vm7, %v2078_v33, %v820_v60  ;;  %v826_v20 = vsel %vm823_vm7, %v820_v60, %v2078_v33  ;;  %v964_v58 = vpop.permute.xlu0 %963 }
 0x1aa   : > { %v771_v19 = vmul.f32 %v1765_v9, %v753_v32  ;;  %v772_v18 = vmul.f32 %v1767_v37, %v755_v54  ;;  %v841_v21 = vmul.f32 %v1769_v29, %v824_v56  ;;  %v842_v26 = vmul.f32 %v2079_v2, %v826_v20  ;;  %v2082_v37 = vld [vmem:[#allocation5_spill] sm:$0xff] }
 0x1ab   : > { %v825_v1 = vsel %vm823_vm7, %v2080_v31, %v822_v16  ;;  %v827_v36 = vsel %vm823_vm7, %v822_v16, %v2080_v31  ;;  %v896_v24 = vsel %vm895_vm8, %v2081_v40, %v892_v25  ;;  %v898_v9 = vsel %vm895_vm8, %v892_v25, %v2081_v40  ;;  %v966_v25 = vpop.permute.xlu1 %965  ;;  %v2095_v31 = vld [vmem:[#allocation29_spill] sm:$0xff] }
 0x1ac   : > { %v788_v5 = vmul.f32 %v2082_v37, %v771_v19  ;;  %v789_v62 = vmul.f32 %v2082_v37, %v772_v18  ;;  %v809_v38 = vmul.f32 %v2083_v17, %v771_v19  ;;  %v810_v52 = vmul.f32 %v2083_v17, %v772_v18 }
 0x1ad   : > { %v858_v63 = vmul.f32 %v2084_v13, %v841_v21  ;;  %v859_v42 = vmul.f32 %v2084_v13, %v842_v26  ;;  %v879_v55 = vmul.f32 %v2085_v41, %v841_v21  ;;  %v880_v43 = vmul.f32 %v2085_v41, %v842_v26 }
 0x1ae   : > { %v792_v57 = vadd.f32 %v788_v5, %v720_v23  ;;  %v793_v34 = vadd.f32 %v789_v62, %v721_v61  ;;  %v813_v35 = vadd.f32 %v809_v38, %v741_v53  ;;  %v814_v7 = vadd.f32 %v810_v52, %v742_v4  ;;  %v2093_v4 = vld [vmem:[#allocation13_spill] sm:$0xff]  ;;  %v2098_v62 = vld [vmem:[#allocation14_spill] sm:$0xff]  ;;  %v2099_v52 = vld [vmem:[#allocation15_spill] sm:$0xff] }
 0x1af   : > { %v862_v30 = vadd.f32 %v858_v63, %v790_v27  ;;  %v863_v60 = vadd.f32 %v859_v42, %v791_v59  ;;  %v883_v8 = vadd.f32 %v879_v55, %v811_v50  ;;  %v884_v22 = vadd.f32 %v880_v43, %v812_v51  ;;  %v2091_v27 = vld [vmem:[#allocation10_spill] sm:$0xff]  ;;  %v2092_v51 = vld [vmem:[#allocation11_spill] sm:$0xff]  ;;  %v2100_v42 = vld [vmem:[#allocation17_spill] sm:$0xff] }
 0x1b0   : > { %v843_v44 = vmul.f32 %v1769_v29, %v825_v1  ;;  %v844_v0 = vmul.f32 %v2079_v2, %v827_v36  ;;  %v913_v39 = vmul.f32 %v2086_v45, %v896_v24  ;;  %v914_v12 = vmul.f32 %v2087_v28, %v898_v9  ;;  %v2094_v2 = vld [vmem:[#allocation28_spill] sm:$0xff] }
 0x1b1   : > { %v897_v47 = vsel %vm895_vm8, %v2088_v48, %v894_v3  ;;  %v899_v14 = vsel %vm895_vm8, %v894_v3, %v2088_v48  ;;  %v968_v46 = vsel %vm967_vm9, %v2089_v15, %v964_v58  ;;  %v970_v29 = vsel %vm967_vm9, %v964_v58, %v2089_v15  ;;  %v2096_v36 = vld [vmem:[#allocation24_spill] sm:$0xff] }
 0x1b2   : > { %v860_v49 = vmul.f32 %v2090_v10, %v843_v44  ;;  %v861_v11 = vmul.f32 %v2090_v10, %v844_v0  ;;  %v881_v59 = vmul.f32 %v2091_v27, %v843_v44  ;;  %v882_v50 = vmul.f32 %v2091_v27, %v844_v0  ;;  %v2097_v9 = vld [vmem:[#allocation12_spill] sm:$0xff]  ;;  %v2102_v0 = vld [vmem:[#allocation18_spill] sm:$0xff] }
 0x1b3   : > { %v930_v16 = vmul.f32 %v2092_v51, %v913_v39  ;;  %v931_v61 = vmul.f32 %v2092_v51, %v914_v12  ;;  %v951_v23 = vmul.f32 %v2093_v4, %v913_v39  ;;  %v952_v53 = vmul.f32 %v2093_v4, %v914_v12 }
 0x1b4   : > { %v864_v32 = vadd.f32 %v860_v49, %v792_v57  ;;  %v865_v54 = vadd.f32 %v861_v11, %v793_v34  ;;  %v885_v33 = vadd.f32 %v881_v59, %v813_v35  ;;  %v886_v56 = vadd.f32 %v882_v50, %v814_v7 }
 0x1b5   : > { %v934_v20 = vadd.f32 %v930_v16, %v862_v30  ;;  %v955_v19 = vadd.f32 %v951_v23, %v883_v8  ;;  %v915_v18 = vmul.f32 %v2086_v45, %v897_v47  ;;  %v916_v21 = vmul.f32 %v2087_v28, %v899_v14  ;;  %v2101_v30 = vld [vmem:[#allocation16_spill] sm:$0xff] }
 0x1b6   : > { %v985_v26 = vmul.f32 %v2094_v2, %v968_v46  ;;  %v986_v1 = vmul.f32 %v2095_v31, %v970_v29  ;;  %v969_v40 = vsel %vm967_vm9, %v2096_v36, %v966_v25  ;;  %v971_v24 = vsel %vm967_vm9, %v966_v25, %v2096_v36  ;;  %v1043_v25 = vld [vmem:[%s2023_s6] sm:$0xff] }
 0x1b7   : > { %v932_v37 = vmul.f32 %v2097_v9, %v915_v18  ;;  %v933_v5 = vmul.f32 %v2097_v9, %v916_v21  ;;  %v953_v17 = vmul.f32 %v2098_v62, %v915_v18  ;;  %v954_v38 = vmul.f32 %v2098_v62, %v916_v21 }
 0x1b8   : > { %v1002_v13 = vmul.f32 %v2099_v52, %v985_v26  ;;  %v1003_v63 = vmul.f32 %v2099_v52, %v986_v1  ;;  %v1023_v41 = vmul.f32 %v2100_v42, %v985_v26  ;;  %v1024_v55 = vmul.f32 %v2100_v42, %v986_v1 }
 0x1b9   : > { %v936_v43 = vadd.f32 %v932_v37, %v864_v32  ;;  %v957_v3 = vadd.f32 %v953_v17, %v885_v33  ;;  %v987_v6 = vmul.f32 %v2094_v2, %v969_v40  ;;  %v988_v57 = vmul.f32 %v2095_v31, %v971_v24  ;;  %v1048_v32 = vpop.permute.xlu0 %1047 }
 0x1ba   : > { %v935_v34 = vadd.f32 %v931_v61, %v863_v60  ;;  %v937_v35 = vadd.f32 %v933_v5, %v865_v54  ;;  %v956_v7 = vadd.f32 %v952_v53, %v884_v22  ;;  %v958_v58 = vadd.f32 %v954_v38, %v886_v56 }
 0x1bb   : > { %v1004_v8 = vmul.f32 %v2101_v30, %v987_v6  ;;  %v1005_v44 = vmul.f32 %v2101_v30, %v988_v57  ;;  %v1025_v45 = vmul.f32 %v2102_v0, %v987_v6  ;;  %v1026_v39 = vmul.f32 %v2102_v0, %v988_v57 }
 0x1bc   : > { %v1007_v28 = vadd.f32 %v1003_v63, %v935_v34  ;;  %v1028_v12 = vadd.f32 %v1024_v55, %v956_v7  ;;  %v1006_v48 = vadd.f32 %v1002_v13, %v934_v20  ;;  %v1027_v47 = vadd.f32 %v1023_v41, %v955_v19 }
 0x1bd   : > { %v1009_v14 = vadd.f32 %v1005_v44, %v937_v35  ;;  %v1030_v15 = vadd.f32 %v1026_v39, %v958_v58  ;;  %v1008_v46 = vadd.f32 %v1004_v8, %v936_v43  ;;  %v1029_v29 = vadd.f32 %v1025_v45, %v957_v3 }
 0x1be   : > { %v1032_v60 = vmax.f32 %v1007_v28, 0.0  ;;  %v1036_v10 = vmax.f32 %v1028_v12, 0.0  ;;  %v1031_v22 = vmax.f32 %v1006_v48, 0.0  ;;  %v1035_v49 = vmax.f32 %v1027_v47, 0.0 }
 0x1bf   : > { %v1034_v11 = vmax.f32 %v1009_v14, 0.0  ;;  %v1038_v27 = vmax.f32 %v1030_v15, 0.0  ;;  %v1033_v59 = vmax.f32 %v1008_v46, 0.0  ;;  %v1037_v50 = vmax.f32 %v1029_v29, 0.0 }
 0x1c0   : > { %v1040_v51 = vmul.f32 %v1036_v10, %v1032_v60  ;;  %v1039_v16 = vmul.f32 %v1035_v49, %v1031_v22 }
 0x1c1   : > { %v1042_v61 = vmul.f32 %v1038_v27, %v1034_v11  ;;  %v1041_v4 = vmul.f32 %v1037_v50, %v1033_v59 }
 0x1c3   : > { %v1261_v23 = vpack.c.bf16 %v1042_v61, %v1040_v51  ;;  %v1263_v53 = vpack.c.bf16 %v1041_v4, %v1039_v16 }
 0x1c5   : > { %1262 = vmatprep.subr.bf16.mxu1 %v1261_v23 }
 0x1c6   : > { %1264 = vmatpush1.bf16.msra.mxu1 %v1263_v53 }
 0x1c9   : > { %1253 = vmatmul.mubr.msk.f32.vlgmr.msra.gmra.mrb[0].mxu1 %vm1050_vm10, %v1043_v25 }
 0x29c   : > { %v1120_v54 = vpop.f32.mrb[0].mxu1 }
 0x29d   : > { %v1121_v33 = vadd.f32 %v1120_v54, %v1048_v32  ;;  %v1122_v56 = vpop.f32.mrb[1].mxu1 }
 0x29e   : > { %v1123_v20 = vadd.f32 %v1122_v56, %v1048_v32 }
 0x29f   : > { %v1125_v19 = vmax.f32 %v1121_v33, 0.0 }
 0x2a0   : > { %v1126_v18 = vmax.f32 %v1123_v20, 0.0 }
 0x2a1   : > { %1127 = vst [vmem:[%s298_s13] sm:$0xff] %v1125_v19 }
 0x2a2   : > { %1128 = vst [vmem:[%s298_s13 + $0x8] sm:$0xff] %v1126_v18 }
 0x2a3   : > { %1330 = shalt.err (!%p1327_p3)
}
 0x2a4   : > { %s1331_s25 = scalar_lea.hbm %s1975_s21, 256  ;;  %s1335_s12 = scalar_lea.hbm %s2025_s8, 512 }
 0x2a5   : > { %p1332_p4 = scmp.ne.s32.totalorder %s1975_s21, %s1331_s25  ;;  %p1336_p9 = scmp.lt.u32.totalorder %s1975_s21, %s2025_s8 }
 0x2a6   : > { %p1337_p10 = scmp.lt.u32.totalorder %s1335_s12, %s1331_s25  ;;  %p1339_p12 = scmp.lt.u32.totalorder %s1331_s25, %s1975_s21 }
 0x2a7   : > { %p1333_p7 = pnand %p1332_p4, %p1475_p5 }
 0x2a8   : > { %p1338_p11 = por %p1337_p10, %p1336_p9 }
 0x2a9   : > { %p1334_p8 = pneg %p1333_p7 }
 0x2aa   : > { %p1340_p13 = por %p1339_p12, %p1338_p11 }
 0x2ac   : > { %p1341_p0 = pnand %p1340_p13, %p1334_p8 }
 0x2ae   : > { %1344 = shalt.err (!%p1341_p0)
}
 0x2af   : > { %1265 = dma.vmem_to_hbm [thread:$0]  (%p1475_p5), %s1977_s17, 256, %s1975_s21, %s1130_s20  }
 0x2b0 PF: > { %p1271_p1 = scmp.ge.s32.totalorder %s1379_s30, 2  ;;  %s1156_s19 = sand.u32 1, %s1367_s27  }
 0x2b1   : > { %s1157_s22 = scalar_lea.sflag [#allocation3], %s1156_s19 }
 0x2b2   : > { %p1268_p2 = pnand %p1271_p1, %p1479_p6 }
 0x2b4   : > { %1362 = dma.done.wait (!%p1268_p2), %s1157_s22, 256  }
 0x2b5   : > { %1364 = vsyncadd (!%p1268_p2), %s1157_s22, 4294967040  ;;  %p18_p3 = scmp.ge.s32.totalorder %s1462_s11, 4   ;;  %s2103_s27 = smov %s1371_s28 }
 0x2b6   : > { %s2104_s28 = smov %s1375_s29  ;;  %s2105_s29 = smov %s1473_s14 }
 0x2b7   : > { %s2106_s30 = smov %s1462_s11  ;;  %20 = sbr.rel (!%p18_p3) target bundleno = 3 (0x3), region = 110 }
 0x2be   :  { %1162 = vsyncpa [#allocation3], 1 }
 0x2bf   :  { %1164 = vsyncpa [#allocation3 + $0x1], 1 }

</bundles_post_ra>
